<compile_context>
chip_gen: v7x
topology: tpu7x:2x2x1
jax: 0.10.0
libtpu: 0.0.40
codegen_flags: <defaults>
</compile_context>

<pallas_src>
import jax
import jax.numpy as jnp
from jax.experimental import pallas as pl
from jax.experimental.pallas import tpu as pltpu

# ---- static problem sizes implied by the module -----------------------------
C, D, H, W = 4, 10, 11, 12                       # LayerNorm normalized shape
K = 5                                            # Conv3d kernel size
CO = 1                                           # Conv3d out channels
DO, HO, WO = D - K + 1, H - K + 1, W - K + 1     # 6, 7, 8 (valid conv)
F_IN = C * D * H * W                             # 5280 features per sample
F_OUT = CO * DO * HO * WO                        # 336 features per sample
F_OUT_PAD = 384                                  # 3 * 128 -> lane-dense stores
S1_COL = F_OUT                                   # pad column holding the ones
EPS = 1e-5                                       # nn.LayerNorm default eps


# ---- Pallas kernel -----------------------------------------------------------
def net_kernel(x_ref, wmat_ref, colsum_ref, bias_ref, o_ref):
    # x_ref:      (TN, F_IN)        raw flattened NCDHW input tile (f32)
    # wmat_ref:   (F_IN, F_OUT_PAD) bf16 gamma-scaled Toeplitz (+ ones column)
    # colsum_ref: (1, F_OUT_PAD)    column sums of the bf16 wmat (f32)
    # bias_ref:   (1, F_OUT_PAD)    beta @ M + conv_bias (f32)
    # o_ref:      (TN, F_OUT_PAD)   padded conv output tile (f32)
    x = x_ref[...]

    # Single bf16 MXU pass with f32 accumulation.  Column S1_COL of wmat is
    # all-ones, so the per-row sum s1 rides along for free on the MXU.
    xw = jnp.dot(x.astype(jnp.bfloat16), wmat_ref[...],
                 preferred_element_type=jnp.float32)          # (TN, F_OUT_PAD)

    s1 = xw[:, S1_COL:S1_COL + 1]                             # == sum(x, axis=1)
    s2 = jnp.sum(x * x, axis=1, keepdims=True)                # f32 VPU pass
    mean = s1 * (1.0 / F_IN)
    var = jnp.maximum(s2 * (1.0 / F_IN) - mean * mean, 0.0)   # clamp: robustness
    inv = jax.lax.rsqrt(var + EPS)

    # LayerNorm centering / scaling as cheap per-row corrections on the narrow
    # (TN, 384) output; gamma/beta/conv_bias already folded into wmat/bias.
    y = inv * (xw - mean * colsum_ref[...]) + bias_ref[...]
    o_ref[...] = y.astype(o_ref.dtype)


# ---- one-time parameter preparation (hoisted out of the forward path) --------
def _build_conv_toeplitz(w_conv):
    """Build (F_IN, F_OUT) matrix M with flatten(conv3d(x)) == flatten(x) @ M."""
    c, kd, kh, kw, od, oh, ow = jnp.meshgrid(
        jnp.arange(C), jnp.arange(K), jnp.arange(K), jnp.arange(K),
        jnp.arange(DO), jnp.arange(HO), jnp.arange(WO), indexing="ij")
    in_idx = ((c * D + (od + kd)) * H + (oh + kh)) * W + (ow + kw)
    out_idx = (od * HO + oh) * WO + ow
    vals = w_conv[0, c, kd, kh, kw]
    mat = jnp.zeros((F_IN, F_OUT), jnp.float32)
    mat = mat.at[in_idx.ravel(), out_idx.ravel()].add(vals.ravel())
    return mat


def prepare_net_params(ln_gamma, ln_beta, conv_w, conv_b):
    """Fold LayerNorm affine + conv bias into the Toeplitz matmul. Run once."""
    base = _build_conv_toeplitz(conv_w)                       # (F_IN, F_OUT) f32
    g = ln_gamma.reshape(F_IN).astype(jnp.float32)
    b = ln_beta.reshape(F_IN).astype(jnp.float32)

    wmat = g[:, None] * base                                  # gamma folded in
    pad = F_OUT_PAD - F_OUT
    wmat_p = jnp.pad(wmat, ((0, 0), (0, pad)))
    wmat_p = wmat_p.at[:, S1_COL].set(1.0)                    # ones -> s1 on MXU
    wmat_bf16 = wmat_p.astype(jnp.bfloat16)                   # bf16 resident

    # colsum must match the bf16 weights actually used in the matmul so the
    # mean-centering cancels exactly against them.
    colsum_p = jnp.sum(wmat_bf16.astype(jnp.float32),
                       axis=0).reshape(1, F_OUT_PAD)

    bias = b @ base + conv_b.reshape(CO)[0]                   # exact f32 folding
    bias_p = jnp.pad(bias, (0, pad)).reshape(1, F_OUT_PAD)
    return wmat_bf16, colsum_p, bias_p


# ---- device-aware tiling defaults --------------------------------------------
def _device_block_defaults():
    """(rows per batch tile, vmem_limit_bytes) derived from the chip's VMEM."""
    vmem = 64 * 1024 * 1024
    try:
        vmem = int(getattr(pltpu.get_tpu_info(), "vmem_capacity_bytes", vmem))
    except Exception:
        pass
    if vmem >= 100 * 1024 * 1024:          # v5e / v6e: 128 MiB physical VMEM
        return 512, 96 * 1024 * 1024
    return 256, 48 * 1024 * 1024           # v7x: 64 MiB per TensorCore


def _pick_tn(n, cap):
    """Batch tile rows: full extent for tiny batches, otherwise a sublane
    multiple sized so the grid has >=2 tiles (megacore) up to `cap`."""
    if n <= 8:
        return n                           # single full-extent block
    half = -(-n // 2)                      # ceil(n/2) -> at least 2 grid tiles
    tn = -(-half // 8) * 8                 # round up to sublane multiple
    return min(cap, tn)


def _resident_spec(shape):
    """Constant-index resident operand: single pipeline buffer (no 2nd copy)."""
    idx = lambda i: (0,) * len(shape)
    try:
        return pl.BlockSpec(shape, idx, pipeline_mode=pl.Buffered(1))
    except TypeError:                      # older JAX without pipeline_mode
        return pl.BlockSpec(shape, idx)


# ---- forward wrapper ---------------------------------------------------------
def net_forward(x_ncdhw, wmat, colsum, bias, *, block_rows=None, vmem_limit=None):
    """x_ncdhw: (N, 4, 10, 11, 12) float32.  Returns (N, 336) float32."""
    N = x_ncdhw.shape[0]
    x2d = x_ncdhw.reshape(N, F_IN)                            # flatten NCDHW

    d_rows, d_vmem = _device_block_defaults()
    if block_rows is None:
        block_rows = d_rows
    if vmem_limit is None:
        vmem_limit = d_vmem

    tn = _pick_tn(N, block_rows)
    grid = pl.cdiv(N, tn)          # ragged last tile handled by Pallas (rows
                                   # are independent, so garbage pad rows are
                                   # harmless and their writes are dropped)

    out = pl.pallas_call(
        net_kernel,
        out_shape=jax.ShapeDtypeStruct((N, F_OUT_PAD), jnp.float32),
        grid_spec=pltpu.PrefetchScalarGridSpec(
            num_scalar_prefetch=0,
            grid=(grid,),
            in_specs=[
                pl.BlockSpec((tn, F_IN), lambda i: (i, 0)),   # x tiles (pipelined)
                _resident_spec((F_IN, F_OUT_PAD)),            # bf16 Toeplitz
                _resident_spec((1, F_OUT_PAD)),               # colsum
                _resident_spec((1, F_OUT_PAD)),               # folded bias
            ],
            out_specs=pl.BlockSpec((tn, F_OUT_PAD), lambda i: (i, 0)),
        ),
        compiler_params=pltpu.CompilerParams(
            dimension_semantics=("parallel",),        # megacore-split the batch
            vmem_limit_bytes=vmem_limit,
        ),
    )(x2d, wmat, colsum, bias)

    return out[:, :F_OUT]                                     # drop pad + s1 col


# ---- pure-JAX reference (silent correctness check) ---------------------------
def ref_forward(x, ln_gamma, ln_beta, conv_w, conv_b):
    mean = jnp.mean(x, axis=(1, 2, 3, 4), keepdims=True)
    var = jnp.mean((x - mean) ** 2, axis=(1, 2, 3, 4), keepdims=True)
    xn = (x - mean) * jax.lax.rsqrt(var + EPS) * ln_gamma + ln_beta
    y = jax.lax.conv_general_dilated(
        xn, conv_w, window_strides=(1, 1, 1), padding="VALID",
        dimension_numbers=("NCDHW", "OIDHW", "NCDHW"))
    y = y + conv_b.reshape(1, CO, 1, 1, 1)
    return y.reshape(x.shape[0], -1)


if __name__ == "__main__":
    key = jax.random.PRNGKey(0)
    k_x, k_g, k_b, k_w, k_cb = jax.random.split(key, 5)

    N = 2
    x = jax.random.normal(k_x, (N, C, D, H, W), jnp.float32)

    # Deterministic synthetic parameters (shapes from the module's __init__).
    ln_gamma = 1.0 + 0.05 * jax.random.normal(k_g, (C, D, H, W), jnp.float32)
    ln_beta = 0.05 * jax.random.normal(k_b, (C, D, H, W), jnp.float32)
    conv_w = 0.1 * jax.random.normal(k_w, (CO, C, K, K, K), jnp.float32)
    conv_b = 0.1 * jax.random.normal(k_cb, (CO,), jnp.float32)

    # One-time parameter folding (hoisted out of the per-call forward path).
    wmat, colsum, bias = jax.jit(prepare_net_params)(
        ln_gamma, ln_beta, conv_w, conv_b)

    fwd = jax.jit(net_forward)
    out = jax.block_until_ready(fwd(x, wmat, colsum, bias))

    ref = ref_forward(x, ln_gamma, ln_beta, conv_w, conv_b)
    assert out.shape == (N, F_OUT)
    # Tolerance deliberately relaxed vs the f32 version: the conv matmul now
    # runs in bf16 (f32 accumulation), giving ~1e-3-level absolute error.
    assert jnp.allclose(out, ref, atol=2e-2, rtol=2e-2)

    print("KERNEL_OK")
</pallas_src>

<mosaic_0001>
module attributes {stable_mosaic.version = 11 : i64} {
  func.func private @main(%arg0: i32) attributes {dimension_semantics = [#tpu.dimension_semantics<core_parallel>], iteration_bounds = array<i64: 2>, tpu.core_type = #tpu.core_type<sc_scalar_subcore>, window_params = []} {
    return
  }
}

module attributes {stable_mosaic.version = 11 : i64} {
  func.func private @main(%arg0: i32) attributes {dimension_semantics = [#tpu.dimension_semantics<core_parallel>], iteration_bounds = array<i64: 2>, tpu.core_type = #tpu.core_type<sc_scalar_subcore>, window_params = []} {
    return
  }
}

</mosaic_0001>

<bundles_post_ra>
// kernel: mul.25
= control target key start
LH: loop header
LB: loop body
LE: loop exit
PB: predicated region body
PF: predicated region fallthrough
CT: control target
= control target key end

     0   :  { %vm63_vm0 = vcmask 31744   ;;  %vm67_vm1 = vcmask 64512   ;;  %vm47_vm2 = vcmask 1042433   ;;  %vm52_vm3 = vcmask 1044483   ;;  %s1603_s14 = smov 124   ;;  %s102_s17 = smov 6  ;;  %s2454_s0 = inlined_call_operand.vmem [shape: f32[4,10,11,12], index: 0, kind: input, shape index: {}]   ;;  %s2455_s1 = inlined_call_operand.hbm [shape: f32[5280], index: 1, kind: output, shape index: {}]  }
   0x1   :  { %v1355_v0 = vld [vmem:[%s2454_s0 + $0xd6] ss:$47 sm:$0x3f]   ;;  %v1367_v3 = vld [vmem:[%s2454_s0 + $0xf5] ss:$47 sm:$0x3f]  }
   0x2   :  { %v1356_v1 = vld [vmem:[%s2454_s0 + $0x105] ss:$47 sm:$0x3f]   ;;  %v1368_v4 = vld [vmem:[%s2454_s0 + $0xf5] ss:$47 sm:$0x3f]  }
   0x3   :  { %v90_v2 = vsel %vm63_vm0, %v1356_v1, %v1355_v0  ;;  %v167_v5 = vsel %vm67_vm1, %v1368_v4, %v1367_v3  ;;  %vm57_vm4 = vcmask 1046533   ;;  %vm61_vm5 = vcmask 1047559   ;;  %v1357_v6 = vld [vmem:[%s2454_s0 + $0xa] sm:$0x1]   ;;  %s107_s18 = smov 24  ;;  %s1604_s19 = smov 120  }
   0x4   :  { %91 = vrot.lane.b32.xlu0 %v90_v2, %s1603_s14  ;;  %168 = vrot.lane.b32.xlu1 %v167_v5, %s1604_s19  ;;  %v1358_v7 = vld [vmem:[%s2454_s0 + $0x3db] ss:$-465 sm:%s102_s17]   ;;  %s112_s22 = smov 96  ;;  %s123_s25 = smov 6  ;;  %vm30_vm6 = vcmask 1043458   ;;  %vm35_vm7 = vcmask 1045508  }
   0x5   :  { %v1361_v8 = vld [vmem:[%s2454_s0 + $0xbf] sm:$0x80]   ;;  %v105_v9 = vsel %vm47_vm2, %v1358_v7, %v1357_v6  ;;  %s128_s30 = smov 24  ;;  %s133_s2 = smov 96  ;;  %v1362_v13 = vld [vmem:[%s2454_s0 + $0xa] sm:$0x1]  }
   0x6   :  { %v1359_v10 = vld [vmem:[%s2454_s0 + $0x7ac] ss:$-465 sm:%s107_s18]   ;;  %s25_s13 = smov 3  ;;  %s28_s15 = smov 12  ;;  %vm40_vm8 = vcmask 1047558   ;;  %vm248_vm9 = vcmask 1045509  }
   0x7   :  { %v1360_v11 = vld [vmem:[%s2454_s0 + $0xb7d] ss:$-465 sm:%s112_s22]   ;;  %v110_v12 = vsel %vm52_vm3, %v1359_v10, %v105_v9  ;;  %v1347_v23 = vld [vmem:[%s2454_s0 + $0x5bc] ss:$-465 sm:%s28_s15]   ;;  %s33_s21 = smov 48  ;;  %s38_s24 = smov 192 }
   0x8   :  { %v1363_v14 = vld [vmem:[%s2454_s0 + $0x3db] ss:$-465 sm:%s123_s25]   ;;  %v115_v16 = vsel %vm57_vm4, %v1360_v11, %v110_v12  ;;  %v1348_v26 = vld [vmem:[%s2454_s0 + $0x98d] ss:$-465 sm:%s33_s21]   ;;  %s45_s25 = smov 6  ;;  %s177_s7 = smov 3 }
   0x9   :  { %v1366_v15 = vld [vmem:[%s2454_s0 + $0xbf] sm:$0x80]   ;;  %v126_v17 = vsel %vm47_vm2, %v1363_v14, %v1362_v13  ;;  %v119_v20 = vsel %vm61_vm5, %v1361_v8, %v115_v16  ;;  %v1346_v22 = vld [vmem:[%s2454_s0 + $0x1f0] ss:$-470 sm:%s25_s13]   ;;  %s180_s11 = smov 12  ;;  %s185_s12 = smov 48 }
   0xa   :  { %v1364_v18 = vld [vmem:[%s2454_s0 + $0x7ac] ss:$-465 sm:%s128_s30]   ;;  %v31_v25 = vsel %vm30_vm6, %v1347_v23, %v1346_v22  ;;  %v1349_v29 = vld [vmem:[%s2454_s0 + $0xd5e] ss:$-465 sm:%s38_s24]   ;;  %s50_s30 = smov 24  ;;  %s190_s18 = smov 192 }
   0xb   :  { %v1365_v19 = vld [vmem:[%s2454_s0 + $0xb7d] ss:$-465 sm:%s133_s2]   ;;  %v131_v21 = vsel %vm52_vm3, %v1364_v18, %v126_v17  ;;  %v36_v28 = vsel %vm35_vm7, %v1348_v26, %v31_v25  ;;  %v1350_v30 = vld [vmem:[%s2454_s0 + $0x1a] sm:$0x1]   ;;  %s55_s2 = smov 96  ;;  %s215_s28 = smov 6 }
   0xc   :  { %v136_v24 = vsel %vm57_vm4, %v1365_v19, %v131_v21  ;;  %v1351_v32 = vld [vmem:[%s2454_s0 + $0x3eb] ss:$-465 sm:%s45_s25]   ;;  %v41_v37 = vsel %vm40_vm8, %v1349_v29, %v36_v28  ;;  %v1379_v47 = vld [vmem:[%s2454_s0 + $0x104] ss:$47 sm:$0x1f]   ;;  %s1605_s29 = smov 116  }
   0xd   :  { %v140_v27 = vsel %vm61_vm5, %v1366_v15, %v136_v24  ;;  %v1352_v33 = vld [vmem:[%s2454_s0 + $0x7bc] ss:$-465 sm:%s50_s30]   ;;  %v48_v34 = vsel %vm47_vm2, %v1351_v32, %v1350_v30  ;;  %v1373_v39 = vld [vmem:[%s2454_s0 + $0x114] ss:$47 sm:$0x1f]   ;;  %s220_s5 = smov 24 }
   0xe   :  { %v142_v31 = vsel %vm67_vm1, %v140_v27, %v119_v20  ;;  %v1353_v35 = vld [vmem:[%s2454_s0 + $0xb8d] ss:$-465 sm:%s55_s2]   ;;  %v53_v38 = vsel %vm52_vm3, %v1352_v33, %v48_v34  ;;  %v1380_v50 = vld [vmem:[%s2454_s0 + $0x1e5] sm:$0x20]   ;;  %v1374_v51 = vld [vmem:[%s2454_s0 + $0x19] sm:$0x1]  }
   0xf   :  { %143 = vrot.lane.b32.xlu1 %v142_v31, %s1604_s19  ;;  %v1354_v36 = vld [vmem:[%s2454_s0 + $0xcf] sm:$0x80]   ;;  %v58_v41 = vsel %vm57_vm4, %v1353_v35, %v53_v38  ;;  %s225_s6 = smov 96  ;;  %v249_v52 = vsel %vm248_vm9, %v1380_v50, %v1379_v47  ;;  %v1375_v53 = vld [vmem:[%s2454_s0 + $0x3ea] ss:$-465 sm:%s215_s28]   ;;  %s258_s9 = smov 6 }
  0x10   :  { %v1369_v40 = vld [vmem:[%s2454_s0 + $0x1fa] ss:$-465 sm:%s177_s7]   ;;  %v62_v44 = vsel %vm61_vm5, %v1354_v36, %v58_v41  ;;  %v1378_v54 = vld [vmem:[%s2454_s0 + $0xce] sm:$0x80]   ;;  %v218_v56 = vsel %vm47_vm2, %v1375_v53, %v1374_v51  ;;  %s263_s15 = smov 24  ;;  %s268_s21 = smov 96 }
  0x11   :  { %v1370_v42 = vld [vmem:[%s2454_s0 + $0x5cb] ss:$-465 sm:%s180_s11]   ;;  %v64_v48 = vsel %vm63_vm0, %v62_v44, %v41_v37  ;;  %v1376_v57 = vld [vmem:[%s2454_s0 + $0x7bb] ss:$-465 sm:%s220_s5]   ;;  %s1606_s22 = smov 112   ;;  %s298_s27 = smov 3 }
  0x12   :  { %v1371_v43 = vld [vmem:[%s2454_s0 + $0x99c] ss:$-465 sm:%s185_s12]   ;;  %v183_v45 = vsel %vm30_vm6, %v1370_v42, %v1369_v40  ;;  %65 = vrot.lane.b32.xlu0 %v64_v48, %s1603_s14  ;;  %v223_v59 = vsel %vm52_vm3, %v1376_v57, %v218_v56  ;;  %v1386_v60 = vld [vmem:[%s2454_s0 + $0xf4] ss:$47 sm:$0x1f]   ;;  %vm330_vm10 = vcmask 1044484  }
  0x13   :  { %v1372_v46 = vld [vmem:[%s2454_s0 - $0x64] ss:$47 sm:%s190_s18]   ;;  %207 = vrot.lane.b32.xlu1 %v1373_v39, %s1605_s29  ;;  %v188_v49 = vsel %vm35_vm7, %v1371_v43, %v183_v45  ;;  %s301_s3 = smov 12  ;;  %v1392_v8 = vld [vmem:[%s2454_s0 + $0x113] ss:$47 sm:$0xf]  }
  0x14   :  { %v193_v55 = vsel %vm40_vm8, %v1372_v46, %v188_v49  ;;  %v1377_v58 = vld [vmem:[%s2454_s0 + $0xb8c] ss:$-465 sm:%s225_s6]   ;;  %v1387_v61 = vld [vmem:[%s2454_s0 + $0x1d5] sm:$0x20]   ;;  %v1381_v63 = vld [vmem:[%s2454_s0 + $0x9] sm:$0x1]  }
  0x15   :  { %v228_v62 = vsel %vm57_vm4, %v1377_v58, %v223_v59  ;;  %v1382_v0 = vld [vmem:[%s2454_s0 + $0x3da] ss:$-465 sm:%s258_s9]   ;;  %v291_v1 = vsel %vm248_vm9, %v1387_v61, %v1386_v60  ;;  %s306_s7 = smov 48  ;;  %v1393_v10 = vld [vmem:[%s2454_s0 + $0x1c6] sm:$0x10]   ;;  %s311_s11 = smov 192 }
  0x16   :  { %194 = vrot.lane.b32.xlu0 %v193_v55, %s1605_s29  ;;  %v261_v2 = vsel %vm47_vm2, %v1382_v0, %v1381_v63  ;;  %v1383_v3 = vld [vmem:[%s2454_s0 + $0x7ab] ss:$-465 sm:%s263_s15]   ;;  %v232_v5 = vsel %vm61_vm5, %v1378_v54, %v228_v62  ;;  %s372_s12 = smov 48  ;;  %s1607_s13 = smov 108   ;;  %v331_v14 = vsel %vm330_vm10, %v1393_v10, %v1392_v8  ;;  %v1401_v31 = vld [vmem:[%s2454_s0 + $0x8] sm:$0x1]  }
  0x17   :  { %250 = vrot.lane.b32.xlu1 %v249_v52, %s1606_s22  ;;  %v1385_v4 = vld [vmem:[%s2454_s0 + $0xbe] sm:$0x80]   ;;  %v266_v6 = vsel %vm52_vm3, %v1383_v3, %v261_v2  ;;  %v1388_v11 = vld [vmem:[%s2454_s0 + $0x1f9] ss:$-465 sm:%s298_s27]   ;;  %s340_s20 = smov 6  ;;  %s345_s25 = smov 24 }
  0x18   :  { %v1384_v7 = vld [vmem:[%s2454_s0 + $0xb7c] ss:$-465 sm:%s268_s21]   ;;  %v1389_v12 = vld [vmem:[%s2454_s0 + $0x5ca] ss:$-465 sm:%s301_s3]   ;;  %s350_s26 = smov 96  ;;  %s415_s2 = smov 48 }
  0x19   :  { %v271_v9 = vsel %vm57_vm4, %v1384_v7, %v266_v6  ;;  %v1399_v13 = vld [vmem:[%s2454_s0 + $0x103] ss:$47 sm:$0xf]   ;;  %v304_v15 = vsel %vm30_vm6, %v1389_v12, %v1388_v11  ;;  %v1390_v16 = vld [vmem:[%s2454_s0 + $0x99b] ss:$-465 sm:%s306_s7]   ;;  %s384_s14 = smov 6 }
  0x1a   :  { %233 = vrot.lane.b32.xlu0 %v232_v5, %s1606_s22  ;;  %v1394_v17 = vld [vmem:[%s2454_s0 + $0x18] sm:$0x1]   ;;  %v275_v18 = vsel %vm61_vm5, %v1385_v4, %v271_v9  ;;  %v1391_v19 = vld [vmem:[%s2454_s0 - $0x65] ss:$47 sm:%s311_s11]   ;;  %v309_v21 = vsel %vm35_vm7, %v1390_v16, %v304_v15  ;;  %s1608_s7 = smov 104   ;;  %s389_s9 = smov 24 }
  0x1b   :  { %292 = vrot.lane.b32.xlu1 %v291_v1, %s1607_s13  ;;  %v1400_v20 = vld [vmem:[%s2454_s0 + $0xfe] ss:$47 sm:%s372_s12]   ;;  %v1406_v28 = vld [vmem:[%s2454_s0 + $0xf3] ss:$47 sm:$0xf]   ;;  %s394_s15 = smov 96  ;;  %v314_v30 = vsel %vm40_vm8, %v1391_v19, %v309_v21 }
  0x1c   :  { %v1395_v22 = vld [vmem:[%s2454_s0 + $0x3e9] ss:$-465 sm:%s340_s20]   ;;  %v375_v26 = vsel %vm35_vm7, %v1400_v20, %v1399_v13  ;;  %v1407_v29 = vld [vmem:[%s2454_s0 + $0xee] ss:$47 sm:%s415_s2]   ;;  %s456_s21 = smov 24  ;;  %s428_s27 = smov 12 }
  0x1d   :  { %v1396_v23 = vld [vmem:[%s2454_s0 + $0x7ba] ss:$-465 sm:%s345_s25]   ;;  %v343_v24 = vsel %vm47_vm2, %v1395_v22, %v1394_v17  ;;  %v1402_v32 = vld [vmem:[%s2454_s0 + $0x3d9] ss:$-465 sm:%s384_s14]   ;;  %s1609_s28 = smov 100   ;;  %v418_v39 = vsel %vm35_vm7, %v1407_v29, %v1406_v28  ;;  %s433_s6 = smov 48 }
  0x1e   :  { %v1397_v25 = vld [vmem:[%s2454_s0 + $0xb8b] ss:$-465 sm:%s350_s26]   ;;  %276 = vrot.lane.b32.xlu0 %v275_v18, %s1607_s13  ;;  %v348_v27 = vsel %vm52_vm3, %v1396_v23, %v343_v24  ;;  %v387_v35 = vsel %vm47_vm2, %v1402_v32, %v1401_v31  ;;  %s425_s26 = smov 3  ;;  %v1412_v40 = vld [vmem:[%s2454_s0 + $0x112] ss:$47 sm:$0x7]  }
  0x1f   :  { %332 = vrot.lane.b32.xlu1 %v331_v14, %s1608_s7  ;;  %v353_v33 = vsel %vm57_vm4, %v1397_v25, %v348_v27  ;;  %v1398_v34 = vld [vmem:[%s2454_s0 + $0xcd] sm:$0x80]   ;;  %v1403_v36 = vld [vmem:[%s2454_s0 + $0x7aa] ss:$-465 sm:%s389_s9]   ;;  %s468_s9 = smov 6  ;;  %s438_s12 = smov 192 }
  0x20   :  { %v392_v37 = vsel %vm52_vm3, %v1403_v36, %v387_v35  ;;  %v1404_v38 = vld [vmem:[%s2454_s0 + $0xb7b] ss:$-465 sm:%s394_s15]   ;;  %v1408_v41 = vld [vmem:[%s2454_s0 + $0x1f8] ss:$-465 sm:%s425_s26]   ;;  %v357_v42 = vsel %vm61_vm5, %v1398_v34, %v353_v33  ;;  %s473_s13 = smov 24  ;;  %s1610_s15 = smov 96  }
  0x21   :  { %v1413_v43 = vld [vmem:[%s2454_s0 + $0x10d] ss:$47 sm:%s456_s21]   ;;  %v397_v45 = vsel %vm57_vm4, %v1404_v38, %v392_v37  ;;  %v1405_v46 = vld [vmem:[%s2454_s0 + $0xbd] sm:$0x80]   ;;  %vm501_vm11 = vcmask 1045507   ;;  %s478_s21 = smov 96 }
  0x22   :  { %315 = vrot.lane.b32.xlu0 %v314_v30, %s1608_s7  ;;  %v1409_v44 = vld [vmem:[%s2454_s0 + $0x5c9] ss:$-465 sm:%s428_s27]   ;;  %v1414_v49 = vld [vmem:[%s2454_s0 + $0x17] sm:$0x1]   ;;  %v459_v50 = vsel %vm52_vm3, %v1413_v43, %v1412_v40  ;;  %s511_s26 = smov 6  ;;  %v401_v53 = vsel %vm61_vm5, %v1405_v46, %v397_v45  ;;  %s516_s2 = smov 24 }
  0x23   :  { %376 = vrot.lane.b32.xlu1 %v375_v26, %s1609_s28  ;;  %v431_v47 = vsel %vm30_vm6, %v1409_v44, %v1408_v41  ;;  %v1410_v48 = vld [vmem:[%s2454_s0 + $0x99a] ss:$-465 sm:%s433_s6]   ;;  %v1419_v51 = vld [vmem:[%s2454_s0 + $0x102] ss:$47 sm:$0x7]   ;;  %s1611_s14 = smov 92  }
  0x24   :  { %v1415_v52 = vld [vmem:[%s2454_s0 + $0x3e8] ss:$-465 sm:%s468_s9]   ;;  %v436_v57 = vsel %vm35_vm7, %v1410_v48, %v431_v47  ;;  %v1411_v58 = vld [vmem:[%s2454_s0 - $0x66] ss:$47 sm:%s438_s12]   ;;  %s521_s12 = smov 96  ;;  %s580_s16 = smov 3 }
  0x25   :  { %v1420_v54 = vld [vmem:[%s2454_s0 + $0xfd] ss:$47 sm:$0x38]   ;;  %v471_v55 = vsel %vm47_vm2, %v1415_v52, %v1414_v49  ;;  %v1426_v61 = vld [vmem:[%s2454_s0 + $0xf2] ss:$47 sm:$0x7]   ;;  %v441_v3 = vsel %vm40_vm8, %v1411_v58, %v436_v57 }
  0x26   :  { %358 = vrot.lane.b32.xlu0 %v357_v42, %s1609_s28  ;;  %v1416_v56 = vld [vmem:[%s2454_s0 + $0x7b9] ss:$-465 sm:%s473_s13]   ;;  %v1421_v62 = vld [vmem:[%s2454_s0 + $0x7] sm:$0x1]   ;;  %v502_v0 = vsel %vm501_vm11, %v1420_v54, %v1419_v51  ;;  %s551_s17 = smov 3  ;;  %vm584_vm12 = vcmask 1044482  }
  0x27   :  { %419 = vrot.lane.b32.xlu1 %v418_v39, %s1610_s15  ;;  %v1417_v59 = vld [vmem:[%s2454_s0 + $0xb8a] ss:$-465 sm:%s478_s21]   ;;  %v476_v60 = vsel %vm52_vm3, %v1416_v56, %v471_v55  ;;  %v1427_v4 = vld [vmem:[%s2454_s0 + $0xed] ss:$47 sm:$0x38]   ;;  %s554_s21 = smov 12 }
  0x28   :  { %v1422_v63 = vld [vmem:[%s2454_s0 + $0x3d8] ss:$-465 sm:%s511_s26]   ;;  %v481_v5 = vsel %vm57_vm4, %v1417_v59, %v476_v60  ;;  %v1418_v6 = vld [vmem:[%s2454_s0 + $0xcc] sm:$0x80]   ;;  %s1612_s26 = smov 88   ;;  %v544_v11 = vsel %vm501_vm11, %v1427_v4, %v1426_v61  ;;  %s594_s7 = smov 6 }
  0x29   :  { %v514_v1 = vsel %vm47_vm2, %v1422_v63, %v1421_v62  ;;  %v1423_v2 = vld [vmem:[%s2454_s0 + $0x7a9] ss:$-465 sm:%s516_s2]   ;;  %v1432_v9 = vld [vmem:[%s2454_s0 + $0x111] ss:$47 sm:%s580_s16]   ;;  %s559_s2 = smov 48  ;;  %v485_v14 = vsel %vm61_vm5, %v1418_v6, %v481_v5  ;;  %s599_s11 = smov 24 }
  0x2a   :  { %402 = vrot.lane.b32.xlu0 %v401_v53, %s1610_s15  ;;  %v1424_v7 = vld [vmem:[%s2454_s0 + $0xb7a] ss:$-465 sm:%s521_s12]   ;;  %v519_v8 = vsel %vm52_vm3, %v1423_v2, %v514_v1  ;;  %v1433_v15 = vld [vmem:[%s2454_s0 + $0x10c] ss:$47 sm:$0x1c]   ;;  %s1613_s18 = smov 84  }
  0x2b   :  { %460 = vrot.lane.b32.xlu1 %v459_v50, %s1611_s14  ;;  %v1428_v10 = vld [vmem:[%s2454_s0 + $0x1f7] ss:$-465 sm:%s551_s17]   ;;  %v1425_v12 = vld [vmem:[%s2454_s0 + $0xbc] sm:$0x80]   ;;  %v524_v17 = vsel %vm57_vm4, %v1424_v7, %v519_v8  ;;  %s638_s17 = smov 6  ;;  %s564_s20 = smov 192  ;;  %v585_v22 = vsel %vm584_vm12, %v1433_v15, %v1432_v9 }
  0x2c   :  { %v1429_v13 = vld [vmem:[%s2454_s0 + $0x5c8] ss:$-465 sm:%s554_s21]   ;;  %v1434_v16 = vld [vmem:[%s2454_s0 + $0x16] sm:$0x1]   ;;  %s604_s27 = smov 96  ;;  %v528_v26 = vsel %vm61_vm5, %v1425_v12, %v524_v17  ;;  %vm628_vm13 = vcmask 1045506  }
  0x2d   :  { %v1430_v18 = vld [vmem:[%s2454_s0 + $0x999] ss:$-465 sm:%s559_s2]   ;;  %v1435_v19 = vld [vmem:[%s2454_s0 + $0x3e7] ss:$-465 sm:%s594_s7]   ;;  %v557_v20 = vsel %vm30_vm6, %v1429_v13, %v1428_v10  ;;  %s643_s3 = smov 24  ;;  %s667_s6 = smov 3 }
  0x2e   :  { %442 = vrot.lane.b32.xlu0 %v441_v3, %s1611_s14  ;;  %s624_s14 = smov 3  ;;  %v1440_v23 = vld [vmem:[%s2454_s0 + $0xfc] ss:$47 sm:$0x3c]   ;;  %v597_v24 = vsel %vm47_vm2, %v1435_v19, %v1434_v16  ;;  %v1441_v27 = vld [vmem:[%s2454_s0 + $0x6] sm:$0x1]   ;;  %v562_v29 = vsel %vm35_vm7, %v1430_v18, %v557_v20 }
  0x2f   :  { %503 = vrot.lane.b32.xlu1 %v502_v0, %s1612_s26  ;;  %v1439_v21 = vld [vmem:[%s2454_s0 + $0x101] ss:$47 sm:%s624_s14]   ;;  %s1614_s14 = smov 80   ;;  %s648_s8 = smov 96  ;;  %v1438_v40 = vld [vmem:[%s2454_s0 + $0xcb] sm:$0x80]  }
  0x30   :  { %v1436_v25 = vld [vmem:[%s2454_s0 + $0x7b8] ss:$-465 sm:%s599_s11]   ;;  %v1442_v28 = vld [vmem:[%s2454_s0 + $0x3d7] ss:$-465 sm:%s638_s17]   ;;  %v629_v33 = vsel %vm628_vm13, %v1440_v23, %v1439_v21  ;;  %s708_s11 = smov 3  ;;  %s679_s12 = smov 3 }
  0x31   :  { %v1431_v30 = vld [vmem:[%s2454_s0 - $0x67] ss:$47 sm:%s564_s20]   ;;  %v602_v31 = vsel %vm52_vm3, %v1436_v25, %v597_v24  ;;  %v1437_v32 = vld [vmem:[%s2454_s0 + $0xb89] ss:$-465 sm:%s604_s27]   ;;  %v641_v34 = vsel %vm47_vm2, %v1442_v28, %v1441_v27  ;;  %s722_s24 = smov 6  ;;  %s1615_s25 = smov 76  }
  0x32   :  { %486 = vrot.lane.b32.xlu0 %v485_v14, %s1612_s26  ;;  %v1443_v35 = vld [vmem:[%s2454_s0 + $0x7a8] ss:$-465 sm:%s643_s3]   ;;  %v567_v36 = vsel %vm40_vm8, %v1431_v30, %v562_v29  ;;  %v607_v39 = vsel %vm57_vm4, %v1437_v32, %v602_v31  ;;  %s687_s30 = smov 48  ;;  %v1453_v46 = vld [vmem:[%s2454_s0 + $0x10b] ss:$47 sm:$0x1c]  }
  0x33   :  { %545 = vrot.lane.b32.xlu1 %v544_v11, %s1613_s18  ;;  %v1446_v37 = vld [vmem:[%s2454_s0 + $0xf1] ss:$47 sm:%s667_s6]   ;;  %v1447_v38 = vld [vmem:[%s2454_s0 + $0xec] ss:$47 sm:$0x3c]   ;;  %v646_v42 = vsel %vm52_vm3, %v1443_v35, %v641_v34  ;;  %s752_s6 = smov 3  ;;  %v611_v48 = vsel %vm61_vm5, %v1438_v40, %v607_v39 }
  0x34   :  { %v1444_v41 = vld [vmem:[%s2454_s0 + $0xb79] ss:$-465 sm:%s648_s8]   ;;  %v1448_v44 = vld [vmem:[%s2454_s0 + $0x1f6] ss:$-465 sm:%s679_s12]   ;;  %v672_v45 = vsel %vm628_vm13, %v1447_v38, %v1446_v37  ;;  %s727_s9 = smov 24  ;;  %s766_s15 = smov 6 }
  0x35   :  { %v1452_v43 = vld [vmem:[%s2454_s0 + $0x110] ss:$42 sm:%s708_s11]   ;;  %v1454_v49 = vld [vmem:[%s2454_s0 + $0x15] sm:$0x1]   ;;  %v651_v51 = vsel %vm57_vm4, %v1444_v41, %v646_v42  ;;  %s1616_s16 = smov 72   ;;  %s692_s17 = smov 192 }
  0x36   :  { %529 = vrot.lane.b32.xlu0 %v528_v26, %s1613_s18  ;;  %s682_s18 = smov 12  ;;  %v1455_v50 = vld [vmem:[%s2454_s0 + $0x3e6] ss:$-465 sm:%s722_s24]   ;;  %v713_v56 = vsel %vm584_vm12, %v1453_v46, %v1452_v43  ;;  %v1461_v61 = vld [vmem:[%s2454_s0 + $0x5] sm:$0x1]   ;;  %s795_s4 = smov 3 }
  0x37   :  { %586 = vrot.lane.b32.xlu1 %v585_v22, %s1614_s14  ;;  %v1449_v47 = vld [vmem:[%s2454_s0 + $0x5c7] ss:$-465 sm:%s682_s18]   ;;  %v1445_v52 = vld [vmem:[%s2454_s0 + $0xbb] sm:$0x80]   ;;  %v725_v58 = vsel %vm47_vm2, %v1455_v50, %v1454_v49  ;;  %s1617_s5 = smov 68   ;;  %s776_s7 = smov 96 }
  0x38   :  { %v1450_v53 = vld [vmem:[%s2454_s0 + $0x998] ss:$-465 sm:%s687_s30]   ;;  %v685_v54 = vsel %vm30_vm6, %v1449_v47, %v1448_v44  ;;  %v1460_v57 = vld [vmem:[%s2454_s0 + $0xfb] ss:$47 sm:$0x3c]   ;;  %v655_v60 = vsel %vm61_vm5, %v1445_v52, %v651_v51  ;;  %s771_s30 = smov 24 }
  0x39   :  { %v1459_v55 = vld [vmem:[%s2454_s0 + $0x100] ss:$42 sm:%s752_s6]   ;;  %v690_v63 = vsel %vm35_vm7, %v1450_v53, %v685_v54  ;;  %v1466_v7 = vld [vmem:[%s2454_s0 + $0xf0] ss:$42 sm:%s795_s4]   ;;  %s845_s21 = smov 6  ;;  %s1618_s22 = smov 64  }
  0x3a   :  { %568 = vrot.lane.b32.xlu0 %v567_v36, %s1614_s14  ;;  %v1456_v59 = vld [vmem:[%s2454_s0 + $0x7b7] ss:$-465 sm:%s727_s9]   ;;  %v757_v3 = vsel %vm628_vm13, %v1460_v57, %v1459_v55  ;;  %s807_s9 = smov 3  ;;  %v1467_v8 = vld [vmem:[%s2454_s0 + $0xeb] ss:$47 sm:$0x3c]  }
  0x3b   :  { %630 = vrot.lane.b32.xlu1 %v629_v33, %s1615_s25  ;;  %v1462_v62 = vld [vmem:[%s2454_s0 + $0x3d6] ss:$-465 sm:%s766_s15]   ;;  %v730_v1 = vsel %vm52_vm3, %v1456_v59, %v725_v58  ;;  %s810_s15 = smov 12  ;;  %v1458_v10 = vld [vmem:[%s2454_s0 + $0xca] sm:$0x80]   ;;  %v800_v14 = vsel %vm628_vm13, %v1467_v8, %v1466_v7  ;;  %s815_s27 = smov 48 }
  0x3c   :  { %v1451_v0 = vld [vmem:[%s2454_s0 - $0x68] ss:$47 sm:%s692_s17]   ;;  %v769_v4 = vsel %vm47_vm2, %v1462_v62, %v1461_v61  ;;  %v1468_v13 = vld [vmem:[%s2454_s0 + $0x1f5] ss:$-465 sm:%s807_s9]   ;;  %s850_s3 = smov 24  ;;  %s884_s6 = smov 6 }
  0x3d   :  { %v1463_v5 = vld [vmem:[%s2454_s0 + $0x7a7] ss:$-465 sm:%s771_s30]   ;;  %v695_v6 = vsel %vm40_vm8, %v1451_v0, %v690_v63  ;;  %v1469_v15 = vld [vmem:[%s2454_s0 + $0x5c6] ss:$-465 sm:%s810_s15]   ;;  %s1619_s14 = smov 60   ;;  %s820_s8 = smov 192 }
  0x3e   :  { %612 = vrot.lane.b32.xlu0 %v611_v48, %s1615_s25  ;;  %s732_s25 = smov 96  ;;  %v1464_v11 = vld [vmem:[%s2454_s0 + $0xb78] ss:$-465 sm:%s776_s7]   ;;  %v774_v12 = vsel %vm52_vm3, %v1463_v5, %v769_v4  ;;  %v813_v21 = vsel %vm30_vm6, %v1469_v15, %v1468_v13  ;;  %v1472_v23 = vld [vmem:[%s2454_s0 + $0x10a] ss:$47 sm:$0x1f]  }
  0x3f   :  { %673 = vrot.lane.b32.xlu1 %v672_v45, %s1616_s16  ;;  %v1457_v2 = vld [vmem:[%s2454_s0 + $0xb88] ss:$-465 sm:%s732_s25]   ;;  %v1473_v17 = vld [vmem:[%s2454_s0 + $0x14] sm:$0x1]   ;;  %v779_v19 = vsel %vm57_vm4, %v1464_v11, %v774_v12  ;;  %s855_s13 = smov 96  ;;  %s889_s20 = smov 24 }
  0x40   :  { %v735_v9 = vsel %vm57_vm4, %v1457_v2, %v730_v1  ;;  %v1474_v18 = vld [vmem:[%s2454_s0 + $0x3e5] ss:$-465 sm:%s845_s21]   ;;  %v1470_v22 = vld [vmem:[%s2454_s0 + $0x997] ss:$-465 sm:%s815_s27]   ;;  %s1620_s23 = smov 56   ;;  %s894_s26 = smov 96 }
  0x41   :  { %v739_v16 = vsel %vm61_vm5, %v1458_v10, %v735_v9  ;;  %v1465_v20 = vld [vmem:[%s2454_s0 + $0xba] sm:$0x80]   ;;  %v848_v24 = vsel %vm47_vm2, %v1474_v18, %v1473_v17  ;;  %v1479_v27 = vld [vmem:[%s2454_s0 + $0x4] sm:$0x1]   ;;  %v818_v29 = vsel %vm35_vm7, %v1470_v22, %v813_v21  ;;  %s920_s2 = smov 3  ;;  %s958_s7 = smov 6 }
  0x42   :  { %656 = vrot.lane.b32.xlu0 %v655_v60, %s1616_s16  ;;  %v1475_v25 = vld [vmem:[%s2454_s0 + $0x7b6] ss:$-465 sm:%s850_s3]   ;;  %v783_v26 = vsel %vm61_vm5, %v1465_v20, %v779_v19  ;;  %s923_s3 = smov 12  ;;  %s1621_s19 = smov 52   ;;  %v1490_v45 = vld [vmem:[%s2454_s0 + $0x13] sm:$0x1]  }
  0x43   :  { %714 = vrot.lane.b32.xlu1 %v713_v56, %s1617_s5  ;;  %v1480_v28 = vld [vmem:[%s2454_s0 + $0x3d5] ss:$-465 sm:%s884_s6]   ;;  %v853_v31 = vsel %vm52_vm3, %v1475_v25, %v848_v24  ;;  %v1478_v33 = vld [vmem:[%s2454_s0 + $0xfa] ss:$47 sm:$0x3f]   ;;  %s928_s15 = smov 48 }
  0x44   :  { %v1471_v30 = vld [vmem:[%s2454_s0 - $0x69] ss:$47 sm:%s820_s8]   ;;  %v1476_v32 = vld [vmem:[%s2454_s0 + $0xb87] ss:$-465 sm:%s855_s13]   ;;  %v887_v34 = vsel %vm47_vm2, %v1480_v28, %v1479_v27  ;;  %s963_s21 = smov 24  ;;  %s997_s24 = smov 6 }
  0x45   :  { %v1481_v35 = vld [vmem:[%s2454_s0 + $0x7a6] ss:$-465 sm:%s889_s20]   ;;  %v823_v36 = vsel %vm40_vm8, %v1471_v30, %v818_v29  ;;  %v858_v37 = vsel %vm57_vm4, %v1476_v32, %v853_v31  ;;  %v1477_v38 = vld [vmem:[%s2454_s0 + $0xc9] sm:$0x80]   ;;  %s1622_s25 = smov 48   ;;  %s933_s28 = smov 192 }
  0x46   :  { %696 = vrot.lane.b32.xlu0 %v695_v6, %s1617_s5  ;;  %v1482_v39 = vld [vmem:[%s2454_s0 + $0xb77] ss:$-465 sm:%s894_s26]   ;;  %v892_v40 = vsel %vm52_vm3, %v1481_v35, %v887_v34  ;;  %v862_v44 = vsel %vm61_vm5, %v1477_v38, %v858_v37  ;;  %v1489_v51 = vld [vmem:[%s2454_s0 + $0x109] ss:$47 sm:$0x1f]   ;;  %s968_s4 = smov 96 }
  0x47   :  { %758 = vrot.lane.b32.xlu1 %v757_v3, %s1618_s22  ;;  %v1485_v41 = vld [vmem:[%s2454_s0 + $0x1f4] ss:$-465 sm:%s920_s2]   ;;  %v1484_v42 = vld [vmem:[%s2454_s0 + $0xea] ss:$47 sm:$0x3f]   ;;  %v897_v47 = vsel %vm57_vm4, %v1482_v39, %v892_v40  ;;  %s1623_s10 = smov 44  }
  0x48   :  { %v1486_v43 = vld [vmem:[%s2454_s0 + $0x5c5] ss:$-465 sm:%s923_s3]   ;;  %v1491_v46 = vld [vmem:[%s2454_s0 + $0x3e4] ss:$-465 sm:%s958_s7]   ;;  %s1007_s13 = smov 96  ;;  %s1033_s20 = smov 3 }
  0x49   :  { %v1483_v48 = vld [vmem:[%s2454_s0 + $0xb9] sm:$0x80]   ;;  %v926_v49 = vsel %vm30_vm6, %v1486_v43, %v1485_v41  ;;  %v1487_v50 = vld [vmem:[%s2454_s0 + $0x996] ss:$-465 sm:%s928_s15]   ;;  %v961_v52 = vsel %vm47_vm2, %v1491_v46, %v1490_v45  ;;  %v1494_v2 = vld [vmem:[%s2454_s0 + $0xc3] sm:$0x80]  }
  0x4a   :  { %740 = vrot.lane.b32.xlu0 %v739_v16, %s1618_s22  ;;  %v1492_v53 = vld [vmem:[%s2454_s0 + $0x7b5] ss:$-465 sm:%s963_s21]   ;;  %v901_v54 = vsel %vm61_vm5, %v1483_v48, %v897_v47  ;;  %v1496_v55 = vld [vmem:[%s2454_s0 + $0x3] sm:$0x1]   ;;  %v931_v57 = vsel %vm35_vm7, %v1487_v50, %v926_v49  ;;  %s1036_s21 = smov 12  ;;  %s1071_s26 = smov 6 }
  0x4b   :  { %801 = vrot.lane.b32.xlu1 %v800_v14, %s1619_s14  ;;  %v1497_v56 = vld [vmem:[%s2454_s0 + $0x3d4] ss:$-465 sm:%s997_s24]   ;;  %v966_v59 = vsel %vm52_vm3, %v1492_v53, %v961_v52  ;;  %v1495_v61 = vld [vmem:[%s2454_s0 + $0xf9] ss:$47 sm:$0x3f]   ;;  %s1624_s27 = smov 40  }
  0x4c   :  { %v1488_v58 = vld [vmem:[%s2454_s0 - $0x4c] ss:$42 sm:%s933_s28]   ;;  %v1000_v62 = vsel %vm47_vm2, %v1497_v56, %v1496_v55  ;;  %vm5_vm14 = vcmask 97280   ;;  %s13_s11 = smov 3  ;;  %s1110_s12 = smov 6 }
  0x4d   :  { %v1493_v60 = vld [vmem:[%s2454_s0 + $0xb86] ss:$-465 sm:%s968_s4]   ;;  %v936_v0 = vsel %vm40_vm8, %v1488_v58, %v931_v57  ;;  %v1499_v3 = vld [vmem:[%s2454_s0 + $0xb76] ss:$-465 sm:%s1007_s13]   ;;  %s1625_s18 = smov 36   ;;  %s1046_s22 = smov 192 }
  0x4e   :  { %784 = vrot.lane.b32.xlu0 %v783_v26, %s1619_s14  ;;  %v971_v1 = vsel %vm57_vm4, %v1493_v60, %v966_v59  ;;  %v1501_v4 = vld [vmem:[%s2454_s0 + $0xe9] ss:$47 sm:$0x3f]   ;;  %v1502_v6 = vld [vmem:[%s2454_s0 + $0x1f3] ss:$-465 sm:%s1033_s20]   ;;  %s1041_s14 = smov 48 }
  0x4f   :  { %837 = vrot.lane.b32.xlu1 %v1472_v23, %s1620_s23  ;;  %v1500_v7 = vld [vmem:[%s2454_s0 + $0xb3] sm:$0x80]   ;;  %v1503_v8 = vld [vmem:[%s2454_s0 + $0x5c4] ss:$-465 sm:%s1036_s21]   ;;  %v975_v10 = vsel %vm61_vm5, %v1494_v2, %v971_v1  ;;  %s1115_s3 = smov 24  ;;  %s1626_s7 = smov 32  }
  0x50   :  { %v1507_v9 = vld [vmem:[%s2454_s0 + $0x12] sm:$0x1]   ;;  %v1343_v13 = vld [vmem:[%s2454_s0 + $0x59] ss:$47 sm:$0xff]   ;;  %v1344_v14 = vld [vmem:[%s2454_s0 + $0x1d1] ss:$47 sm:%s13_s11]   ;;  %v1039_v15 = vsel %vm30_vm6, %v1503_v8, %v1502_v6 }
  0x51   :  { %v1508_v11 = vld [vmem:[%s2454_s0 + $0x3e3] ss:$-465 sm:%s1071_s26]   ;;  %v1504_v16 = vld [vmem:[%s2454_s0 + $0x995] ss:$-465 sm:%s1041_s14]   ;;  %11 = vst.msk [vmem:[#allocation0 + $0x6] ss:$3 sm:$0xff] %vm5_vm14, %v1343_v13  }
  0x52   :  { %824 = vrot.lane.b32.xlu0 %v823_v36, %s1620_s23  ;;  %17 = vst.msk [vmem:[#allocation0 + $0x1e] ss:$3 sm:$0x3] %vm5_vm14, %v1344_v14   ;;  %v1506_v17 = vld [vmem:[%s2454_s0 + $0x108] ss:$47 sm:$0x1f]   ;;  %v1074_v18 = vsel %vm47_vm2, %v1508_v11, %v1507_v9  ;;  %v1044_v23 = vsel %vm35_vm7, %v1504_v16, %v1039_v15 }
  0x53   :  { %876 = vrot.lane.b32.xlu1 %v1478_v33, %s1621_s19  ;;  %v1513_v21 = vld [vmem:[%s2454_s0 + $0x2] sm:$0x1]   ;;  %v1505_v24 = vld [vmem:[%s2454_s0 - $0x70] ss:$47 sm:%s1046_s22]   ;;  %s1120_s9 = smov 96  ;;  %s3_s13 = smov 3 }
  0x54   :  { %v1514_v22 = vld [vmem:[%s2454_s0 + $0x3d3] ss:$-465 sm:%s1110_s12]   ;;  %v1512_v25 = vld [vmem:[%s2454_s0 + $0xf8] ss:$47 sm:$0x3f]   ;;  %s19_s15 = smov 3  ;;  %v1049_v30 = vsel %vm40_vm8, %v1505_v24, %v1044_v23 }
  0x55   :  { %v1113_v28 = vsel %vm47_vm2, %v1514_v22, %v1513_v21  ;;  %v1515_v29 = vld [vmem:[%s2454_s0 + $0x7a4] ss:$-465 sm:%s1115_s3]   ;;  %v1511_v31 = vld [vmem:[%s2454_s0 + $0xc2] sm:$0x80]   ;;  %s1184_s24 = smov 6 }
  0x56   :  { %863 = vrot.lane.b32.xlu0 %v862_v44, %s1621_s19  ;;  %s1002_s19 = smov 24  ;;  %v4_v32 = vld [vmem:[%s2454_s0] ss:$42 sm:%s3_s13]   ;;  %v1118_v36 = vsel %vm52_vm3, %v1515_v29, %v1113_v28 }
  0x57   :  { %914 = vrot.lane.b32.xlu1 %v1484_v42, %s1622_s25  ;;  %v1498_v63 = vld [vmem:[%s2454_s0 + $0x7a5] ss:$-465 sm:%s1002_s19]   ;;  %6 = vst.msk [vmem:[#allocation0] ss:$3 sm:$0x3] %vm5_vm14, %v4_v32  }
  0x58   :  { %v1005_v5 = vsel %vm52_vm3, %v1498_v63, %v1000_v62  ;;  %v1516_v34 = vld [vmem:[%s2454_s0 + $0xb8e] ss:$-470 sm:%s1120_s9]  }
  0x59   :  { %v1010_v12 = vsel %vm57_vm4, %v1499_v3, %v1005_v5  ;;  %v1345_v35 = vld [vmem:[%s2454_s0 + $0x22a] ss:$47 sm:%s19_s15]  }
  0x5a   :  { %902 = vrot.lane.b32.xlu0 %v901_v54, %s1622_s25  ;;  %v1014_v20 = vsel %vm61_vm5, %v1500_v7, %v1010_v12  ;;  %23 = vst.msk [vmem:[#allocation0 + $0x24] ss:$3 sm:$0x3] %vm5_vm14, %v1345_v35  }
  0x5b   :  { %950 = vrot.lane.b32.xlu1 %v1489_v51, %s1623_s10 }
  0x5e   :  { %937 = vrot.lane.b32.xlu0 %v936_v0, %s1623_s10  ;;  %s1076_s10 = smov 24 }
  0x5f   :  { %989 = vrot.lane.b32.xlu1 %v1495_v61, %s1624_s27  ;;  %v1509_v19 = vld [vmem:[%s2454_s0 + $0x7b4] ss:$-465 sm:%s1076_s10]   ;;  %s1146_s10 = smov 3 }
  0x60   :  { %v1079_v26 = vsel %vm52_vm3, %v1509_v19, %v1074_v18  ;;  %v1519_v37 = vld [vmem:[%s2454_s0 + $0x1f2] ss:$-465 sm:%s1146_s10]  }
  0x62   :  { %976 = vrot.lane.b32.xlu0 %v975_v10, %s1624_s27  ;;  %s1081_s27 = smov 96 }
  0x63   :  { %1027 = vrot.lane.b32.xlu1 %v1501_v4, %s1625_s18  ;;  %v1510_v27 = vld [vmem:[%s2454_s0 + $0xb9e] ss:$-470 sm:%s1081_s27]   ;;  %s1627_s27 = smov 28  }
  0x64   :  { %v1084_v33 = vsel %vm57_vm4, %v1510_v27, %v1079_v26 }
  0x66   :  { %1015 = vrot.lane.b32.xlu0 %v1014_v20, %s1625_s18  ;;  %s1149_s18 = smov 12 }
  0x67   :  { %1063 = vrot.lane.b32.xlu1 %v1506_v17, %s1626_s7 }
  0x6b   :  { %1102 = vrot.lane.b32.xlu1 %v1512_v25, %s1627_s27 }
  0x6c   :  { %2 = vsyncpa [#allocation1], 0  ;;  %1050 = vrot.lane.b32.xlu0 %v1049_v30, %s1626_s7  ;;  %v1518_v38 = vld [vmem:[%s2454_s0 + $0xe8] ss:$47 sm:$0x3f]   ;;  %s1154_s5 = smov 48  ;;  %v1088_v40 = vsel %vm61_vm5, %v1511_v31, %v1084_v33  ;;  %v1123_v43 = vsel %vm57_vm4, %v1516_v34, %v1118_v36 }
  0x6d   :  { %v1520_v39 = vld [vmem:[%s2454_s0 + $0x5c3] ss:$-465 sm:%s1149_s18]   ;;  %v1524_v41 = vld [vmem:[%s2454_s0 + $0x11] sm:$0x1]   ;;  %s1189_s8 = smov 24  ;;  %s1223_s11 = smov 6 }
  0x6e   :  { %v1525_v42 = vld [vmem:[%s2454_s0 + $0x3e2] ss:$-465 sm:%s1184_s24]   ;;  %v1517_v44 = vld [vmem:[%s2454_s0 + $0xb2] sm:$0x80]   ;;  %s1628_s12 = smov 24   ;;  %v1152_v45 = vsel %vm30_vm6, %v1520_v39, %v1519_v37  ;;  %s1159_s16 = smov 192 }
  0x6f   :  { %1140 = vrot.lane.b32.xlu1 %v1518_v38, %s1628_s12  ;;  %v1521_v46 = vld [vmem:[%s2454_s0 + $0x9a8] ss:$-470 sm:%s1154_s5]   ;;  %v1523_v47 = vld [vmem:[%s2454_s0 + $0xd8] ss:$47 sm:$0x3f]   ;;  %v1187_v48 = vsel %vm47_vm2, %v1525_v42, %v1524_v41  ;;  %s1194_s22 = smov 96  ;;  %v1127_v50 = vsel %vm61_vm5, %v1517_v44, %v1123_v43 }
  0x70   :  { %1089 = vrot.lane.b32.xlu0 %v1088_v40, %s1627_s27  ;;  %v1526_v49 = vld [vmem:[%s2454_s0 + $0x7c2] ss:$-470 sm:%s1189_s8]   ;;  %v1530_v51 = vld [vmem:[%s2454_s0 + $0x1] sm:$0x1]   ;;  %s1228_s27 = smov 24  ;;  %v1157_v53 = vsel %vm35_vm7, %v1521_v46, %v1152_v45  ;;  %s1629_s30 = smov 20  }
  0x71   :  { %v1531_v52 = vld [vmem:[%s2454_s0 + $0x3d2] ss:$-465 sm:%s1223_s11]   ;;  %v1522_v54 = vld [vmem:[%s2454_s0 + $0xd60] ss:$-465 sm:%s1159_s16]   ;;  %v1192_v55 = vsel %vm52_vm3, %v1526_v49, %v1187_v48  ;;  %s1233_s4 = smov 96  ;;  %s1259_s19 = smov 3 }
  0x72   :  { %v1527_v56 = vld [vmem:[%s2454_s0 + $0xb7f] ss:$-465 sm:%s1194_s22]   ;;  %v1529_v57 = vld [vmem:[%s2454_s0 + $0xf7] ss:$47 sm:$0x3f]   ;;  %v1226_v58 = vsel %vm47_vm2, %v1531_v52, %v1530_v51  ;;  %v1162_v60 = vsel %vm40_vm8, %v1522_v54, %v1157_v53  ;;  %s1262_s8 = smov 12 }
  0x73   :  { %1176 = vrot.lane.b32.xlu1 %v1523_v47, %s1629_s30  ;;  %v1532_v59 = vld [vmem:[%s2454_s0 + $0x7b2] ss:$-470 sm:%s1228_s27]   ;;  %v1197_v61 = vsel %vm57_vm4, %v1527_v56, %v1192_v55  ;;  %v1528_v62 = vld [vmem:[%s2454_s0 + $0xc1] sm:$0x80]   ;;  %vm76_vm15 = vcmask 1048544   ;;  %s1297_s13 = smov 6 }
  0x74   :  { %1128 = vrot.lane.b32.xlu0 %v1127_v50, %s1628_s12  ;;  %v1533_v63 = vld [vmem:[%s2454_s0 + $0xb6f] ss:$-465 sm:%s1233_s4]   ;;  %s1630_s15 = smov 16   ;;  %v1231_v0 = vsel %vm52_vm3, %v1532_v59, %v1226_v58  ;;  %vm154_vm9 = vcmask 1048512   ;;  %s1267_s23 = smov 48  ;;  %v1201_v5 = vsel %vm61_vm5, %v1528_v62, %v1197_v61  ;;  %vm570_vm10 = vcmask 753280  }
  0x75   :  { %v1536_v1 = vld [vmem:[%s2454_s0 + $0x1f1] ss:$-465 sm:%s1259_s19]   ;;  %v1535_v2 = vld [vmem:[%s2454_s0 + $0xe7] ss:$47 sm:$0x3f]   ;;  %s1302_s28 = smov 24  ;;  %v1236_v9 = vsel %vm57_vm4, %v1533_v63, %v1231_v0 }
  0x76   :  { %v92_v3 = vpop.permute.xlu0 %91   ;;  %v1537_v4 = vld [vmem:[%s2454_s0 + $0x5cc] ss:$-470 sm:%s1262_s8]   ;;  %v169_v6 = vpop.permute.xlu1 %168   ;;  %v1541_v7 = vld [vmem:[%s2454_s0 + $0x10] sm:$0x1]   ;;  %v1534_v10 = vld [vmem:[%s2454_s0 + $0xb1] sm:$0x80]  }
  0x77   :  { %1215 = vrot.lane.b32.xlu1 %v1529_v57, %s1630_s15  ;;  %95 = vst.msk [vmem:[#allocation0 + $0xe] ss:$3 sm:$0x3f] %vm67_vm1, %v92_v3   ;;  %v1542_v8 = vld [vmem:[%s2454_s0 + $0x3e6] ss:$-470 sm:%s1297_s13]   ;;  %s1631_s2 = smov 12   ;;  %v1265_v11 = vsel %vm30_vm6, %v1537_v4, %v1536_v1  ;;  %v1240_v16 = vsel %vm61_vm5, %v1534_v10, %v1236_v9 }
  0x78   :  { %1163 = vrot.lane.b32.xlu0 %v1162_v60, %s1629_s30  ;;  %98 = vst.msk [vmem:[#allocation0 + $0x10] ss:$3 sm:$0x3f] %vm76_vm15, %v92_v3   ;;  %v1538_v12 = vld [vmem:[%s2454_s0 + $0x98e] ss:$-465 sm:%s1267_s23]   ;;  %s1272_s5 = smov 192  ;;  %v1300_v14 = vsel %vm47_vm2, %v1542_v8, %v1541_v7 }
  0x79   :  { %172 = vst.msk [vmem:[#allocation0 + $0x10] ss:$3 sm:$0x3f] %vm63_vm0, %v169_v6   ;;  %v1540_v13 = vld [vmem:[%s2454_s0 + $0xd7] ss:$47 sm:$0x3f]   ;;  %v1270_v17 = vsel %vm35_vm7, %v1538_v12, %v1265_v11 }
  0x7a   :  { %175 = vst.msk [vmem:[#allocation0 + $0xf] ss:$3 sm:$0x3f] %vm154_vm9, %v169_v6   ;;  %v1543_v15 = vld [vmem:[%s2454_s0 + $0x7ad] ss:$-465 sm:%s1302_s28]   ;;  %s1307_s8 = smov 96 }
  0x7b   :  { %1253 = vrot.lane.b32.xlu1 %v1535_v2, %s1631_s2  ;;  %v1539_v18 = vld [vmem:[%s2454_s0 + $0xd5f] ss:$-465 sm:%s1272_s5]   ;;  %s1632_s11 = smov 8   ;;  %v1305_v19 = vsel %vm52_vm3, %v1543_v15, %v1300_v14  ;;  %v1546_v21 = vld [vmem:[%s2454_s0 + $0xf6] ss:$47 sm:$0x3f]  }
  0x7c   :  { %1202 = vrot.lane.b32.xlu0 %v1201_v5, %s1630_s15  ;;  %v1544_v20 = vld [vmem:[%s2454_s0 + $0xb7e] ss:$-465 sm:%s1307_s8]   ;;  %v1275_v22 = vsel %vm40_vm8, %v1539_v18, %v1270_v17  ;;  %vm196_vm2 = vcmask 1048480   ;;  %vm317_vm3 = vcmask 950080   ;;  %vm444_vm6 = vcmask 851680   ;;  %s1634_s20 = smov [#allocation0]  }
  0x7d   :  { %v1310_v24 = vsel %vm57_vm4, %v1544_v20, %v1305_v19  ;;  %v1545_v25 = vld [vmem:[%s2454_s0 + $0xc0] sm:$0x80]   ;;  %s1633_s0 = smov 4   ;;  %vm360_vm4 = vcmask 917280   ;;  %vm488_vm7 = vcmask 818880   ;;  %vm531_vm8 = vcmask 786080  }
  0x7e   :  { %v1314_v26 = vsel %vm61_vm5, %v1545_v25, %v1310_v24  ;;  %vm404_vm5 = vcmask 884480   ;;  %vm614_vm11 = vcmask 720480   ;;  %vm658_vm12 = vcmask 687680   ;;  %s1337_s21 = sshll.u32 %s1634_s20, 4  ;;  %s1338_s21 = int_to_ptr.vmem [resolvable:$true] %s1337_s21 }
  0x7f   :  { %1289 = vrot.lane.b32.xlu1 %v1540_v13, %s1632_s11  ;;  %vm698_vm13 = vcmask 654880   ;;  %vm742_vm14 = vcmask 622080   ;;  %s1579_s22 = scalar_lea.vmem %s1338_s21, 768  ;;  %p1584_p1 = scmp.lt.s32.totalorder %s1338_s21, %s1338_s21 }
  0x80   :  { %1241 = vrot.lane.b32.xlu0 %v1240_v16, %s1631_s2  ;;  %p1580_p0 = scmp.ne.s32.totalorder %s1338_s21, %s1579_s22  ;;  %p1585_p2 = scmp.lt.s32.totalorder %s1579_s22, %s1579_s22 }
  0x81   :  { %v144_v23 = vpop.permute.xlu1 %143  }
  0x82   :  { %161 = vst.msk [vmem:[#allocation0 - $0x9] ss:$3 sm:$0xc0] %vm154_vm9, %v144_v23   ;;  %155 = vst.msk [vmem:[#allocation0] ss:$33 sm:$0x3] %vm154_vm9, %v144_v23   ;;  %p1586_p3 = por %p1585_p2, %p1584_p1 }
  0x83   :  { %157 = vst.msk [vmem:[#allocation0 - $0x3f] ss:$33 sm:$0xc] %vm154_vm9, %v144_v23   ;;  %159 = vst.msk [vmem:[#allocation0 - $0x7e] ss:$33 sm:$0x30] %vm154_vm9, %v144_v23   ;;  %1328 = vrot.lane.b32.xlu1 %v1546_v21, %s1633_s0 }
  0x84   :  { %1276 = vrot.lane.b32.xlu0 %v1275_v22, %s1632_s11  ;;  %v66_v28 = vpop.permute.xlu0 %65   ;;  %vm826_vm9 = vcmask 556480   ;;  %p1587_p4 = pnand %p1586_p3, %p1580_p0 }
  0x85   :  { %v208_v27 = vpop.permute.xlu1 %207   ;;  %69 = vst.msk [vmem:[#allocation0 + $0x20] ss:$-30 sm:$0x3] %vm67_vm1, %v66_v28   ;;  %71 = vst.msk [vmem:[#allocation0 + $0x5f] ss:$-30 sm:$0xc] %vm67_vm1, %v66_v28  }
  0x86   :  { %211 = vst.msk [vmem:[#allocation0 + $0x11] ss:$3 sm:$0x1f] %vm196_vm2, %v208_v27  }
  0x87   :  { %73 = vst.msk [vmem:[#allocation0 + $0x9e] ss:$-30 sm:$0x30] %vm67_vm1, %v66_v28   ;;  %75 = vst.msk [vmem:[#allocation0 + $0xdd] ss:$-30 sm:$0xc0] %vm67_vm1, %v66_v28  }
  0x88   :  { %78 = vst.msk [vmem:[#allocation0 + $0x1] ss:$33 sm:$0x3] %vm76_vm15, %v66_v28   ;;  %80 = vst.msk [vmem:[#allocation0 - $0x3e] ss:$33 sm:$0xc] %vm76_vm15, %v66_v28   ;;  %1315 = vrot.lane.b32.xlu0 %v1314_v26, %s1633_s0  ;;  %v195_v30 = vpop.permute.xlu0 %194  }
  0x89   :  { %82 = vst.msk [vmem:[#allocation0 - $0x7d] ss:$33 sm:$0x30] %vm76_vm15, %v66_v28   ;;  %84 = vst.msk [vmem:[#allocation0 - $0x8] ss:$3 sm:$0xc0] %vm76_vm15, %v66_v28   ;;  %v251_v29 = vpop.permute.xlu1 %250  }
  0x8a   :  { %vm235_vm1 = vcmask 1015680   ;;  %147 = vst.msk [vmem:[#allocation0 + $0x1] ss:$33 sm:$0x3] %vm63_vm0, %v144_v23   ;;  %vm786_vm15 = vcmask 589280  }
  0x8b   :  { %149 = vst.msk [vmem:[#allocation0 - $0x3e] ss:$33 sm:$0xc] %vm63_vm0, %v144_v23   ;;  %151 = vst.msk [vmem:[#allocation0 - $0x7d] ss:$33 sm:$0x30] %vm63_vm0, %v144_v23  }
  0x8c   :  { %153 = vst.msk [vmem:[#allocation0 - $0x8] ss:$3 sm:$0xc0] %vm63_vm0, %v144_v23   ;;  %vm278_vm0 = vcmask 982880   ;;  %v234_v32 = vpop.permute.xlu0 %233  }
  0x8d   :  { %254 = vst.msk [vmem:[#allocation0 + $0x10] ss:$3 sm:$0x3f] %vm235_vm1, %v251_v29   ;;  %v293_v31 = vpop.permute.xlu1 %292   ;;  %237 = vst.msk [vmem:[#allocation0 + $0x1] ss:$33 sm:$0x3] %vm235_vm1, %v234_v32  }
  0x8e   :  { %198 = vst.msk [vmem:[#allocation0 + $0x20] ss:$-30 sm:$0x3] %vm196_vm2, %v195_v30   ;;  %200 = vst.msk [vmem:[#allocation0 + $0x5f] ss:$-30 sm:$0xc] %vm196_vm2, %v195_v30  }
  0x8f   :  { %202 = vst.msk [vmem:[#allocation0 + $0x9e] ss:$-30 sm:$0x30] %vm196_vm2, %v195_v30   ;;  %204 = vst.msk [vmem:[#allocation0 - $0x7] ss:$3 sm:$0xc0] %vm196_vm2, %v195_v30  }
  0x90   :  { %296 = vst.msk [vmem:[#allocation0 + $0xf] ss:$3 sm:$0x3f] %vm278_vm0, %v293_v31   ;;  %v277_v34 = vpop.permute.xlu0 %276   ;;  %vm865_vm2 = vcmask 523680  }
  0x91   :  { %239 = vst.msk [vmem:[#allocation0 - $0x3e] ss:$33 sm:$0xc] %vm235_vm1, %v234_v32   ;;  %241 = vst.msk [vmem:[#allocation0 - $0x7d] ss:$33 sm:$0x30] %vm235_vm1, %v234_v32   ;;  %v333_v33 = vpop.permute.xlu1 %332  }
  0x92   :  { %243 = vst.msk [vmem:[#allocation0 - $0x8] ss:$3 sm:$0xc0] %vm235_vm1, %v234_v32   ;;  %vm904_vm1 = vcmask 490880  }
  0x93   :  { %336 = vst.msk [vmem:[#allocation0 + $0x11] ss:$3 sm:$0x1f] %vm317_vm3, %v333_v33  }
  0x94   :  { %279 = vst.msk [vmem:[#allocation0] ss:$33 sm:$0x3] %vm278_vm0, %v277_v34   ;;  %281 = vst.msk [vmem:[#allocation0 - $0x3f] ss:$33 sm:$0xc] %vm278_vm0, %v277_v34   ;;  %v316_v36 = vpop.permute.xlu0 %315  }
  0x95   :  { %283 = vst.msk [vmem:[#allocation0 - $0x7e] ss:$33 sm:$0x30] %vm278_vm0, %v277_v34   ;;  %285 = vst.msk [vmem:[#allocation0 - $0x9] ss:$3 sm:$0xc0] %vm278_vm0, %v277_v34   ;;  %v377_v35 = vpop.permute.xlu1 %376  }
  0x96   :  { %380 = vst.msk [vmem:[#allocation0 + $0x10] ss:$3 sm:$0x3f] %vm360_vm4, %v377_v35   ;;  %vm939_vm0 = vcmask 458080  }
  0x97   :  { %319 = vst.msk [vmem:[#allocation0 + $0x20] ss:$-30 sm:$0x3] %vm317_vm3, %v316_v36   ;;  %321 = vst.msk [vmem:[#allocation0 + $0x5f] ss:$-30 sm:$0xc] %vm317_vm3, %v316_v36  }
  0x98   :  { %323 = vst.msk [vmem:[#allocation0 + $0x9e] ss:$-30 sm:$0x30] %vm317_vm3, %v316_v36   ;;  %325 = vst.msk [vmem:[#allocation0 - $0x7] ss:$3 sm:$0xc0] %vm317_vm3, %v316_v36   ;;  %v359_v38 = vpop.permute.xlu0 %358  }
  0x99   :  { %v420_v37 = vpop.permute.xlu1 %419   ;;  %362 = vst.msk [vmem:[#allocation0 + $0x1] ss:$33 sm:$0x3] %vm360_vm4, %v359_v38   ;;  %364 = vst.msk [vmem:[#allocation0 - $0x3e] ss:$33 sm:$0xc] %vm360_vm4, %v359_v38  }
  0x9a   :  { %423 = vst.msk [vmem:[#allocation0 + $0xf] ss:$3 sm:$0x3f] %vm404_vm5, %v420_v37   ;;  %vm978_vm3 = vcmask 425280  }
  0x9b   :  { %366 = vst.msk [vmem:[#allocation0 - $0x7d] ss:$33 sm:$0x30] %vm360_vm4, %v359_v38   ;;  %368 = vst.msk [vmem:[#allocation0 - $0x8] ss:$3 sm:$0xc0] %vm360_vm4, %v359_v38  }
  0x9c   :  { %v403_v40 = vpop.permute.xlu0 %402   ;;  %vm1017_vm4 = vcmask 392480  }
  0x9d   :  { %v461_v39 = vpop.permute.xlu1 %460   ;;  %405 = vst.msk [vmem:[#allocation0] ss:$33 sm:$0x3] %vm404_vm5, %v403_v40   ;;  %407 = vst.msk [vmem:[#allocation0 - $0x3f] ss:$33 sm:$0xc] %vm404_vm5, %v403_v40  }
  0x9e   :  { %464 = vst.msk [vmem:[#allocation0 + $0x11] ss:$3 sm:$0x1f] %vm444_vm6, %v461_v39  }
  0x9f   :  { %409 = vst.msk [vmem:[#allocation0 - $0x7e] ss:$33 sm:$0x30] %vm404_vm5, %v403_v40   ;;  %411 = vst.msk [vmem:[#allocation0 - $0x9] ss:$3 sm:$0xc0] %vm404_vm5, %v403_v40  }
  0xa0   :  { %v443_v42 = vpop.permute.xlu0 %442   ;;  %vm1052_vm5 = vcmask 359680  }
  0xa1   :  { %v504_v41 = vpop.permute.xlu1 %503   ;;  %446 = vst.msk [vmem:[#allocation0 + $0x20] ss:$-30 sm:$0x3] %vm444_vm6, %v443_v42   ;;  %448 = vst.msk [vmem:[#allocation0 + $0x5f] ss:$-30 sm:$0xc] %vm444_vm6, %v443_v42  }
  0xa2   :  { %507 = vst.msk [vmem:[#allocation0 + $0x10] ss:$3 sm:$0x3f] %vm488_vm7, %v504_v41  }
  0xa3   :  { %450 = vst.msk [vmem:[#allocation0 + $0x9e] ss:$-30 sm:$0x30] %vm444_vm6, %v443_v42   ;;  %452 = vst.msk [vmem:[#allocation0 - $0x7] ss:$3 sm:$0xc0] %vm444_vm6, %v443_v42  }
  0xa4   :  { %v487_v44 = vpop.permute.xlu0 %486   ;;  %vm1091_vm6 = vcmask 326880  }
  0xa5   :  { %v546_v43 = vpop.permute.xlu1 %545   ;;  %490 = vst.msk [vmem:[#allocation0 + $0x1] ss:$33 sm:$0x3] %vm488_vm7, %v487_v44   ;;  %492 = vst.msk [vmem:[#allocation0 - $0x3e] ss:$33 sm:$0xc] %vm488_vm7, %v487_v44  }
  0xa6   :  { %549 = vst.msk [vmem:[#allocation0 + $0xf] ss:$3 sm:$0x3f] %vm531_vm8, %v546_v43  }
  0xa7   :  { %494 = vst.msk [vmem:[#allocation0 - $0x7d] ss:$33 sm:$0x30] %vm488_vm7, %v487_v44   ;;  %496 = vst.msk [vmem:[#allocation0 - $0x8] ss:$3 sm:$0xc0] %vm488_vm7, %v487_v44  }
  0xa8   :  { %v530_v46 = vpop.permute.xlu0 %529   ;;  %vm1130_vm7 = vcmask 294080  }
  0xa9   :  { %v587_v45 = vpop.permute.xlu1 %586   ;;  %532 = vst.msk [vmem:[#allocation0] ss:$33 sm:$0x3] %vm531_vm8, %v530_v46   ;;  %534 = vst.msk [vmem:[#allocation0 - $0x3f] ss:$33 sm:$0xc] %vm531_vm8, %v530_v46  }
  0xaa   :  { %590 = vst.msk [vmem:[#allocation0 + $0x11] ss:$3 sm:$0x1f] %vm570_vm10, %v587_v45  }
  0xab   :  { %536 = vst.msk [vmem:[#allocation0 - $0x7e] ss:$33 sm:$0x30] %vm531_vm8, %v530_v46   ;;  %538 = vst.msk [vmem:[#allocation0 - $0x9] ss:$3 sm:$0xc0] %vm531_vm8, %v530_v46  }
  0xac   :  { %v569_v48 = vpop.permute.xlu0 %568   ;;  %vm1165_vm8 = vcmask 261280  }
  0xad   :  { %v631_v47 = vpop.permute.xlu1 %630   ;;  %572 = vst.msk [vmem:[#allocation0 + $0x20] ss:$-30 sm:$0x3] %vm570_vm10, %v569_v48   ;;  %574 = vst.msk [vmem:[#allocation0 + $0x5f] ss:$-30 sm:$0xc] %vm570_vm10, %v569_v48  }
  0xae   :  { %634 = vst.msk [vmem:[#allocation0 + $0x10] ss:$3 sm:$0x3f] %vm614_vm11, %v631_v47  }
  0xaf   :  { %576 = vst.msk [vmem:[#allocation0 + $0x9e] ss:$-30 sm:$0x30] %vm570_vm10, %v569_v48   ;;  %578 = vst.msk [vmem:[#allocation0 - $0x7] ss:$3 sm:$0xc0] %vm570_vm10, %v569_v48  }
  0xb0   :  { %v613_v50 = vpop.permute.xlu0 %612   ;;  %vm1204_vm10 = vcmask 228480  }
  0xb1   :  { %v674_v49 = vpop.permute.xlu1 %673   ;;  %616 = vst.msk [vmem:[#allocation0 + $0x1] ss:$33 sm:$0x3] %vm614_vm11, %v613_v50   ;;  %618 = vst.msk [vmem:[#allocation0 - $0x3e] ss:$33 sm:$0xc] %vm614_vm11, %v613_v50  }
  0xb2   :  { %677 = vst.msk [vmem:[#allocation0 + $0xf] ss:$3 sm:$0x3f] %vm658_vm12, %v674_v49  }
  0xb3   :  { %620 = vst.msk [vmem:[#allocation0 - $0x7d] ss:$33 sm:$0x30] %vm614_vm11, %v613_v50   ;;  %622 = vst.msk [vmem:[#allocation0 - $0x8] ss:$3 sm:$0xc0] %vm614_vm11, %v613_v50  }
  0xb4   :  { %v657_v52 = vpop.permute.xlu0 %656   ;;  %vm1243_vm11 = vcmask 195680  }
  0xb5   :  { %v715_v51 = vpop.permute.xlu1 %714   ;;  %659 = vst.msk [vmem:[#allocation0] ss:$33 sm:$0x3] %vm658_vm12, %v657_v52   ;;  %661 = vst.msk [vmem:[#allocation0 - $0x3f] ss:$33 sm:$0xc] %vm658_vm12, %v657_v52  }
  0xb6   :  { %718 = vst.msk [vmem:[#allocation0 + $0x11] ss:$3 sm:$0x1f] %vm698_vm13, %v715_v51  }
  0xb7   :  { %663 = vst.msk [vmem:[#allocation0 - $0x7e] ss:$33 sm:$0x30] %vm658_vm12, %v657_v52   ;;  %665 = vst.msk [vmem:[#allocation0 - $0x9] ss:$3 sm:$0xc0] %vm658_vm12, %v657_v52  }
  0xb8   :  { %v697_v54 = vpop.permute.xlu0 %696   ;;  %vm1278_vm12 = vcmask 162880  }
  0xb9   :  { %v759_v53 = vpop.permute.xlu1 %758   ;;  %700 = vst.msk [vmem:[#allocation0 + $0x20] ss:$-30 sm:$0x3] %vm698_vm13, %v697_v54   ;;  %702 = vst.msk [vmem:[#allocation0 + $0x5f] ss:$-30 sm:$0xc] %vm698_vm13, %v697_v54  }
  0xba   :  { %762 = vst.msk [vmem:[#allocation0 + $0x10] ss:$3 sm:$0x3f] %vm742_vm14, %v759_v53  }
  0xbb   :  { %704 = vst.msk [vmem:[#allocation0 + $0x9e] ss:$-30 sm:$0x30] %vm698_vm13, %v697_v54   ;;  %706 = vst.msk [vmem:[#allocation0 - $0x7] ss:$3 sm:$0xc0] %vm698_vm13, %v697_v54  }
  0xbc   :  { %v741_v56 = vpop.permute.xlu0 %740   ;;  %vm1317_vm13 = vcmask 130080  }
  0xbd   :  { %v802_v55 = vpop.permute.xlu1 %801   ;;  %744 = vst.msk [vmem:[#allocation0 + $0x1] ss:$33 sm:$0x3] %vm742_vm14, %v741_v56   ;;  %746 = vst.msk [vmem:[#allocation0 - $0x3e] ss:$33 sm:$0xc] %vm742_vm14, %v741_v56  }
  0xbe   :  { %805 = vst.msk [vmem:[#allocation0 + $0xf] ss:$3 sm:$0x3f] %vm786_vm15, %v802_v55  }
  0xbf   :  { %748 = vst.msk [vmem:[#allocation0 - $0x7d] ss:$33 sm:$0x30] %vm742_vm14, %v741_v56   ;;  %750 = vst.msk [vmem:[#allocation0 - $0x8] ss:$3 sm:$0xc0] %vm742_vm14, %v741_v56  }
  0xc0   :  { %v785_v58 = vpop.permute.xlu0 %784  }
  0xc1   :  { %v838_v57 = vpop.permute.xlu1 %837   ;;  %787 = vst.msk [vmem:[#allocation0] ss:$33 sm:$0x3] %vm786_vm15, %v785_v58   ;;  %789 = vst.msk [vmem:[#allocation0 - $0x3f] ss:$33 sm:$0xc] %vm786_vm15, %v785_v58  }
  0xc2   :  { %841 = vst.msk [vmem:[#allocation0 + $0x11] ss:$3 sm:$0x1f] %vm826_vm9, %v838_v57  }
  0xc3   :  { %791 = vst.msk [vmem:[#allocation0 - $0x7e] ss:$33 sm:$0x30] %vm786_vm15, %v785_v58   ;;  %793 = vst.msk [vmem:[#allocation0 - $0x9] ss:$3 sm:$0xc0] %vm786_vm15, %v785_v58  }
  0xc4   :  { %v825_v60 = vpop.permute.xlu0 %824  }
  0xc5   :  { %v877_v59 = vpop.permute.xlu1 %876   ;;  %828 = vst.msk [vmem:[#allocation0 + $0x20] ss:$-30 sm:$0x3] %vm826_vm9, %v825_v60   ;;  %830 = vst.msk [vmem:[#allocation0 + $0x5f] ss:$-30 sm:$0xc] %vm826_vm9, %v825_v60  }
  0xc6   :  { %880 = vst.msk [vmem:[#allocation0 + $0x10] ss:$3 sm:$0x3f] %vm865_vm2, %v877_v59  }
  0xc7   :  { %832 = vst.msk [vmem:[#allocation0 + $0x9e] ss:$-30 sm:$0x30] %vm826_vm9, %v825_v60   ;;  %834 = vst.msk [vmem:[#allocation0 - $0x7] ss:$3 sm:$0xc0] %vm826_vm9, %v825_v60  }
  0xc8   :  { %v864_v62 = vpop.permute.xlu0 %863  }
  0xc9   :  { %v915_v61 = vpop.permute.xlu1 %914   ;;  %867 = vst.msk [vmem:[#allocation0 + $0x1] ss:$33 sm:$0x3] %vm865_vm2, %v864_v62   ;;  %869 = vst.msk [vmem:[#allocation0 - $0x3e] ss:$33 sm:$0xc] %vm865_vm2, %v864_v62  }
  0xca   :  { %918 = vst.msk [vmem:[#allocation0 + $0xf] ss:$3 sm:$0x3f] %vm904_vm1, %v915_v61  }
  0xcb   :  { %871 = vst.msk [vmem:[#allocation0 - $0x7d] ss:$33 sm:$0x30] %vm865_vm2, %v864_v62   ;;  %873 = vst.msk [vmem:[#allocation0 - $0x8] ss:$3 sm:$0xc0] %vm865_vm2, %v864_v62  }
  0xcc   :  { %v903_v0 = vpop.permute.xlu0 %902  }
  0xcd   :  { %v951_v63 = vpop.permute.xlu1 %950   ;;  %905 = vst.msk [vmem:[#allocation0] ss:$33 sm:$0x3] %vm904_vm1, %v903_v0   ;;  %907 = vst.msk [vmem:[#allocation0 - $0x3f] ss:$33 sm:$0xc] %vm904_vm1, %v903_v0  }
  0xce   :  { %954 = vst.msk [vmem:[#allocation0 + $0x11] ss:$3 sm:$0x1f] %vm939_vm0, %v951_v63  }
  0xcf   :  { %909 = vst.msk [vmem:[#allocation0 - $0x7e] ss:$33 sm:$0x30] %vm904_vm1, %v903_v0   ;;  %911 = vst.msk [vmem:[#allocation0 - $0x9] ss:$3 sm:$0xc0] %vm904_vm1, %v903_v0  }
  0xd0   :  { %v938_v2 = vpop.permute.xlu0 %937  }
  0xd1   :  { %v990_v1 = vpop.permute.xlu1 %989   ;;  %941 = vst.msk [vmem:[#allocation0 + $0x20] ss:$-30 sm:$0x3] %vm939_vm0, %v938_v2   ;;  %943 = vst.msk [vmem:[#allocation0 + $0x5f] ss:$-30 sm:$0xc] %vm939_vm0, %v938_v2  }
  0xd2   :  { %993 = vst.msk [vmem:[#allocation0 + $0x10] ss:$3 sm:$0x3f] %vm978_vm3, %v990_v1  }
  0xd3   :  { %945 = vst.msk [vmem:[#allocation0 + $0x9e] ss:$-30 sm:$0x30] %vm939_vm0, %v938_v2   ;;  %947 = vst.msk [vmem:[#allocation0 - $0x7] ss:$3 sm:$0xc0] %vm939_vm0, %v938_v2  }
  0xd4   :  { %v977_v4 = vpop.permute.xlu0 %976  }
  0xd5   :  { %v1028_v3 = vpop.permute.xlu1 %1027   ;;  %980 = vst.msk [vmem:[#allocation0 + $0x1] ss:$33 sm:$0x3] %vm978_vm3, %v977_v4   ;;  %982 = vst.msk [vmem:[#allocation0 - $0x3e] ss:$33 sm:$0xc] %vm978_vm3, %v977_v4  }
  0xd6   :  { %1031 = vst.msk [vmem:[#allocation0 + $0xf] ss:$3 sm:$0x3f] %vm1017_vm4, %v1028_v3  }
  0xd7   :  { %984 = vst.msk [vmem:[#allocation0 - $0x7d] ss:$33 sm:$0x30] %vm978_vm3, %v977_v4   ;;  %986 = vst.msk [vmem:[#allocation0 - $0x8] ss:$3 sm:$0xc0] %vm978_vm3, %v977_v4  }
  0xd8   :  { %v1016_v6 = vpop.permute.xlu0 %1015  }
  0xd9   :  { %v1064_v5 = vpop.permute.xlu1 %1063   ;;  %1018 = vst.msk [vmem:[#allocation0] ss:$33 sm:$0x3] %vm1017_vm4, %v1016_v6   ;;  %1020 = vst.msk [vmem:[#allocation0 - $0x3f] ss:$33 sm:$0xc] %vm1017_vm4, %v1016_v6  }
  0xda   :  { %1067 = vst.msk [vmem:[#allocation0 + $0x11] ss:$3 sm:$0x1f] %vm1052_vm5, %v1064_v5  }
  0xdb   :  { %1022 = vst.msk [vmem:[#allocation0 - $0x7e] ss:$33 sm:$0x30] %vm1017_vm4, %v1016_v6   ;;  %1024 = vst.msk [vmem:[#allocation0 - $0x9] ss:$3 sm:$0xc0] %vm1017_vm4, %v1016_v6  }
  0xdd   :  { %v1103_v7 = vpop.permute.xlu1 %1102  }
  0xde   :  { %v1051_v8 = vpop.permute.xlu0 %1050   ;;  %1106 = vst.msk [vmem:[#allocation0 + $0x10] ss:$3 sm:$0x3f] %vm1091_vm6, %v1103_v7  }
  0xdf   :  { %1054 = vst.msk [vmem:[#allocation0 + $0x20] ss:$-30 sm:$0x3] %vm1052_vm5, %v1051_v8   ;;  %1056 = vst.msk [vmem:[#allocation0 + $0x5f] ss:$-30 sm:$0xc] %vm1052_vm5, %v1051_v8  }
  0xe0   :  { %1058 = vst.msk [vmem:[#allocation0 + $0x9e] ss:$-30 sm:$0x30] %vm1052_vm5, %v1051_v8   ;;  %1060 = vst.msk [vmem:[#allocation0 - $0x7] ss:$3 sm:$0xc0] %vm1052_vm5, %v1051_v8  }
  0xe1   :  { %v1141_v9 = vpop.permute.xlu1 %1140  }
  0xe2   :  { %v1090_v10 = vpop.permute.xlu0 %1089   ;;  %1144 = vst.msk [vmem:[#allocation0 + $0xf] ss:$3 sm:$0x3f] %vm1130_vm7, %v1141_v9  }
  0xe3   :  { %1093 = vst.msk [vmem:[#allocation0 + $0x1] ss:$33 sm:$0x3] %vm1091_vm6, %v1090_v10   ;;  %1095 = vst.msk [vmem:[#allocation0 - $0x3e] ss:$33 sm:$0xc] %vm1091_vm6, %v1090_v10  }
  0xe4   :  { %1097 = vst.msk [vmem:[#allocation0 - $0x7d] ss:$33 sm:$0x30] %vm1091_vm6, %v1090_v10   ;;  %1099 = vst.msk [vmem:[#allocation0 - $0x8] ss:$3 sm:$0xc0] %vm1091_vm6, %v1090_v10  }
  0xe5   :  { %v1177_v11 = vpop.permute.xlu1 %1176  }
  0xe6   :  { %v1129_v12 = vpop.permute.xlu0 %1128   ;;  %1180 = vst.msk [vmem:[#allocation0 + $0xe] ss:$3 sm:$0x3f] %vm1165_vm8, %v1177_v11  }
  0xe7   :  { %1131 = vst.msk [vmem:[#allocation0] ss:$33 sm:$0x3] %vm1130_vm7, %v1129_v12   ;;  %1133 = vst.msk [vmem:[#allocation0 - $0x3f] ss:$33 sm:$0xc] %vm1130_vm7, %v1129_v12  }
  0xe8   :  { %1135 = vst.msk [vmem:[#allocation0 - $0x7e] ss:$33 sm:$0x30] %vm1130_vm7, %v1129_v12   ;;  %1137 = vst.msk [vmem:[#allocation0 - $0x9] ss:$3 sm:$0xc0] %vm1130_vm7, %v1129_v12  }
  0xe9   :  { %v1216_v13 = vpop.permute.xlu1 %1215  }
  0xea   :  { %v1164_v14 = vpop.permute.xlu0 %1163   ;;  %1219 = vst.msk [vmem:[#allocation0 + $0x10] ss:$3 sm:$0x3f] %vm1204_vm10, %v1216_v13  }
  0xeb   :  { %1167 = vst.msk [vmem:[#allocation0 + $0x20] ss:$-30 sm:$0x3] %vm1165_vm8, %v1164_v14   ;;  %1169 = vst.msk [vmem:[#allocation0 + $0x5f] ss:$-30 sm:$0xc] %vm1165_vm8, %v1164_v14  }
  0xec   :  { %1171 = vst.msk [vmem:[#allocation0 + $0x9e] ss:$-30 sm:$0x30] %vm1165_vm8, %v1164_v14   ;;  %1173 = vst.msk [vmem:[#allocation0 + $0xdd] ss:$-30 sm:$0xc0] %vm1165_vm8, %v1164_v14  }
  0xed   :  { %v1254_v15 = vpop.permute.xlu1 %1253  }
  0xee   :  { %v1203_v16 = vpop.permute.xlu0 %1202   ;;  %1257 = vst.msk [vmem:[#allocation0 + $0xf] ss:$3 sm:$0x3f] %vm1243_vm11, %v1254_v15  }
  0xef   :  { %1206 = vst.msk [vmem:[#allocation0 + $0x1] ss:$33 sm:$0x3] %vm1204_vm10, %v1203_v16   ;;  %1208 = vst.msk [vmem:[#allocation0 - $0x3e] ss:$33 sm:$0xc] %vm1204_vm10, %v1203_v16  }
  0xf0   :  { %1210 = vst.msk [vmem:[#allocation0 - $0x7d] ss:$33 sm:$0x30] %vm1204_vm10, %v1203_v16   ;;  %1212 = vst.msk [vmem:[#allocation0 - $0x8] ss:$3 sm:$0xc0] %vm1204_vm10, %v1203_v16  }
  0xf1   :  { %v1290_v17 = vpop.permute.xlu1 %1289  }
  0xf2   :  { %v1242_v18 = vpop.permute.xlu0 %1241   ;;  %1293 = vst.msk [vmem:[#allocation0 + $0xe] ss:$3 sm:$0x3f] %vm1278_vm12, %v1290_v17  }
  0xf3   :  { %1244 = vst.msk [vmem:[#allocation0] ss:$33 sm:$0x3] %vm1243_vm11, %v1242_v18   ;;  %1246 = vst.msk [vmem:[#allocation0 - $0x3f] ss:$33 sm:$0xc] %vm1243_vm11, %v1242_v18  }
  0xf4   :  { %1248 = vst.msk [vmem:[#allocation0 - $0x7e] ss:$33 sm:$0x30] %vm1243_vm11, %v1242_v18   ;;  %1250 = vst.msk [vmem:[#allocation0 - $0x9] ss:$3 sm:$0xc0] %vm1243_vm11, %v1242_v18  }
  0xf5   :  { %v1329_v19 = vpop.permute.xlu1 %1328  }
  0xf6   :  { %v1277_v20 = vpop.permute.xlu0 %1276   ;;  %1332 = vst.msk [vmem:[#allocation0 + $0x10] ss:$3 sm:$0x3f] %vm1317_vm13, %v1329_v19  }
  0xf7   :  { %1280 = vst.msk [vmem:[#allocation0 + $0x20] ss:$-30 sm:$0x3] %vm1278_vm12, %v1277_v20   ;;  %1282 = vst.msk [vmem:[#allocation0 + $0x5f] ss:$-30 sm:$0xc] %vm1278_vm12, %v1277_v20  }
  0xf8   :  { %1284 = vst.msk [vmem:[#allocation0 + $0x9e] ss:$-30 sm:$0x30] %vm1278_vm12, %v1277_v20   ;;  %1286 = vst.msk [vmem:[#allocation0 + $0xdd] ss:$-30 sm:$0xc0] %vm1278_vm12, %v1277_v20  }
  0xfa   :  { %v1316_v21 = vpop.permute.xlu0 %1315  }
  0xfb   :  { %1319 = vst.msk [vmem:[#allocation0 + $0x1] ss:$33 sm:$0x3] %vm1317_vm13, %v1316_v21   ;;  %1321 = vst.msk [vmem:[#allocation0 - $0x3e] ss:$33 sm:$0xc] %vm1317_vm13, %v1316_v21  }
  0xfc   :  { %1323 = vst.msk [vmem:[#allocation0 - $0x7d] ss:$33 sm:$0x30] %vm1317_vm13, %v1316_v21   ;;  %1325 = vst.msk [vmem:[#allocation0 - $0x8] ss:$3 sm:$0xc0] %vm1317_vm13, %v1316_v21  }
  0xfd   :  { %1590 = shalt.err (!%p1587_p4)
}
  0xfe   :  { %s1591_s25 = scalar_lea.hbm %s2455_s1, 768 }
  0xff   :  { %p1592_p5 = scmp.ne.s32.totalorder %s2455_s1, %s1591_s25  ;;  %p1595_p6 = scmp.lt.u32.totalorder %s1591_s25, %s2455_s1 }
 0x101   :  { %p1597_p7 = pnand %p1595_p6, %p1592_p5 }
 0x103   :  { %1600 = shalt.err (!%p1597_p7)
}
 0x104   :  { %1340 = dma.vmem_to_hbm [thread:$0]  %s1338_s21, 768, %s2455_s1, [#allocation1]  }
 0x105   :  { %1601 = dma.done.wait [#allocation1], 768  }
 0x106   :  { %1602 = vsyncadd [#allocation1], 4294966528 }
 0x107   :  { %1342 = vsyncpa [#allocation1], 1 }

</bundles_post_ra>
